<compile_context>
chip_gen: v5e
topology: v5e:2x2
jax: 0.10.0
libtpu: 0.0.40
codegen_flags: <defaults>
</compile_context>

<pallas_src>
import functools

import jax
import jax.numpy as jnp
from jax import lax
from jax.experimental import pallas as pl
from jax.experimental.pallas import tpu as pltpu

_MIB = 1024 * 1024


def _mase_kernel(insample_ref, forecast_ref, target_ref, mask_ref, out_ref,
                 *, freq: int, batch: int, use_roll: bool,
                 need_row_mask: bool):
    tb, ti = insample_ref.shape
    inv_cnt = 1.0 / float(ti - freq)

    ins = insample_ref[...].astype(jnp.float32)            # (TB, Ti)

    if use_roll:
        # pltpu.roll follows jnp.roll semantics: rolled[:, i] = ins[:, i-freq]
        # (mod Ti).  Lanes i >= freq hold valid seasonal differences
        # ins[i] - ins[i-freq]; wrapped lanes (i < freq) are zeroed.  The
        # count of valid lanes is the compile-time constant (Ti - freq).
        rolled = pltpu.roll(ins, shift=freq, axis=1)
        idx = lax.broadcasted_iota(jnp.int32, (tb, ti), 1)
        d = jnp.where(idx >= freq, jnp.abs(ins - rolled), 0.0)
        masep = jnp.sum(d, axis=1, keepdims=True) * inv_cnt   # (TB, 1)
    else:
        # Small / lane-unaligned time axes: static-slice formulation.
        d = jnp.abs(ins[:, freq:] - ins[:, :-freq])            # (TB, Ti-freq)
        masep = jnp.sum(d, axis=1, keepdims=True) * inv_cnt

    # divide_no_nan, hoisted to the (TB, 1) column:
    #   r = 1/masep with NaN and +inf replaced by 0; since mask >= 0 and
    #   masep >= 0, mask * r reproduces divide_no_nan(mask, masep[:, None]).
    r = pl.reciprocal(masep, approx=False)
    r = jnp.where(jnp.isnan(r) | (r == jnp.inf), 0.0, r)       # (TB, 1)

    err = jnp.abs(target_ref[...].astype(jnp.float32)
                  - forecast_ref[...].astype(jnp.float32))
    contrib = err * (mask_ref[...].astype(jnp.float32) * r)

    if need_row_mask:
        # Zero out padding rows of the last (partial) batch block.
        row = (pl.program_id(0) * tb
               + lax.broadcasted_iota(jnp.int32, (tb, 1), 0))
        contrib = jnp.where(row < batch, contrib, 0.0)

    # Lane-dense per-block partial sum (one full vreg, unmasked store).
    out_ref[...] = jnp.broadcast_to(jnp.sum(contrib), out_ref.shape)


def _vmem_budgets() -> tuple[int, int]:
    """Generation-aware (double-buffered input-tile budget, vmem limit)."""
    cap = None
    try:
        cap = getattr(pltpu.get_tpu_info(), "vmem_capacity_bytes", None)
    except Exception:                                   # pragma: no cover
        cap = None
    if cap is None:
        cap = 64 * _MIB                  # conservative: v7x-class per-TC VMEM
    # Leave ~16 MiB headroom below physical, never exceed 96 MiB scoped.
    vmem_limit = max(16 * _MIB, min(96 * _MIB, int(cap) - 16 * _MIB))
    input_budget = vmem_limit // 2       # live double-buffered input tiles
    return input_budget, vmem_limit


def _round_up(x: int, m: int) -> int:
    return ((x + m - 1) // m) * m


def _pick_batch_tile(batch: int, bytes_per_row: int, input_budget: int) -> int:
    """Batch tile: as big as the VMEM budget allows, but never a single block
    for batch >= 16 (keep both v7x TensorCores busy and the pipeline primed)."""
    if batch < 16:
        return batch                     # tiny batch: one full block
    tb = max(8, ((input_budget // (2 * bytes_per_row)) // 8) * 8)
    if batch >= 32:
        tb = min(tb, max(8, _round_up(pl.cdiv(batch, 4), 8)))   # >= ~4 blocks
    else:
        tb = min(tb, max(8, _round_up(pl.cdiv(batch, 2), 8)))   # >= 2 blocks
    return tb


def mase_loss(insample: jax.Array, freq: int, forecast: jax.Array,
              target: jax.Array, mask: jax.Array,
              *, tile_b: int | None = None) -> jax.Array:
    """Pallas implementation of mase_loss.forward. Returns a scalar f32.

    Inputs may be f32 / bf16 / fp16; all math is done in f32 in-kernel.
    """
    assert insample.ndim == 2 and forecast.ndim == 2
    assert forecast.shape == target.shape == mask.shape
    assert insample.shape[0] == forecast.shape[0]

    batch, time_i = insample.shape
    _, time_o = forecast.shape
    freq = int(freq)
    assert 0 < freq < time_i

    bytes_per_row = (insample.dtype.itemsize * time_i
                     + (forecast.dtype.itemsize + target.dtype.itemsize
                        + mask.dtype.itemsize) * time_o)
    input_budget, vmem_limit = _vmem_budgets()

    tb = (_pick_batch_tile(batch, bytes_per_row, input_budget)
          if tile_b is None else int(tile_b))
    num_blocks = pl.cdiv(batch, tb)
    need_row_mask = (num_blocks * tb != batch)
    use_roll = (time_i % 128 == 0)   # full-width roll path only when lane-aligned

    kernel = functools.partial(
        _mase_kernel, freq=freq, batch=batch,
        use_roll=use_roll, need_row_mask=need_row_mask)

    in_specs = [
        pl.BlockSpec((tb, time_i), lambda i: (i, 0)),
        pl.BlockSpec((tb, time_o), lambda i: (i, 0)),
        pl.BlockSpec((tb, time_o), lambda i: (i, 0)),
        pl.BlockSpec((tb, time_o), lambda i: (i, 0)),
    ]
    out_specs = pl.BlockSpec((1, 8, 128), lambda i: (i, 0, 0))
    out_shape = jax.ShapeDtypeStruct((num_blocks, 8, 128), jnp.float32)

    cost = pl.CostEstimate(
        flops=3 * batch * time_i + 6 * batch * time_o,
        transcendentals=0,
        bytes_accessed=batch * bytes_per_row + 4 * num_blocks * 8 * 128,
    )

    partials = pl.pallas_call(
        kernel,
        grid=(num_blocks,),
        in_specs=in_specs,
        out_specs=out_specs,
        out_shape=out_shape,
        compiler_params=pltpu.CompilerParams(
            dimension_semantics=("parallel",),
            vmem_limit_bytes=int(vmem_limit)),
        cost_estimate=cost,
    )(insample, forecast, target, mask)

    total = jnp.sum(partials[:, 0, 0])
    return total / (batch * time_o)


def _mase_loss_ref(insample, freq, forecast, target, mask):
    """Pure-JAX reference mirroring the PyTorch code (f32 math)."""
    insample = insample.astype(jnp.float32)
    forecast = forecast.astype(jnp.float32)
    target = target.astype(jnp.float32)
    mask = mask.astype(jnp.float32)
    masep = jnp.mean(jnp.abs(insample[:, freq:] - insample[:, :-freq]), axis=1)
    inv = mask / masep[:, None]
    inv = jnp.where(jnp.isnan(inv) | (inv == jnp.inf), 0.0, inv)
    return jnp.mean(jnp.abs(target - forecast) * inv)


if __name__ == "__main__":
    key = jax.random.PRNGKey(0)

    # cfg 1: slice path, tiny shapes, single block
    # cfg 2: lane-aligned roll path, single block
    # cfg 3: roll path, explicit tile -> padded last block (row mask)
    # cfg 4: roll path, auto tiling -> multiple blocks (megacore split)
    # cfg 5: bf16 inputs (half the HBM traffic), auto tiling
    configs = [
        dict(batch=2, time_i=32, time_o=8, freq=4, tile_b=None,
             dtype=jnp.float32, rtol=1e-5, atol=1e-6),
        dict(batch=4, time_i=128, time_o=128, freq=12, tile_b=None,
             dtype=jnp.float32, rtol=1e-5, atol=1e-6),
        dict(batch=10, time_i=128, time_o=128, freq=7, tile_b=8,
             dtype=jnp.float32, rtol=1e-5, atol=1e-6),
        dict(batch=64, time_i=128, time_o=128, freq=24, tile_b=None,
             dtype=jnp.float32, rtol=1e-5, atol=1e-6),
        dict(batch=32, time_i=128, time_o=64, freq=12, tile_b=None,
             dtype=jnp.bfloat16, rtol=1e-4, atol=1e-5),
    ]

    for cfg in configs:
        key, k1, k2, k3, k4 = jax.random.split(key, 5)
        dt = cfg["dtype"]
        insample = jax.random.normal(k1, (cfg["batch"], cfg["time_i"]),
                                     jnp.float32).astype(dt)
        forecast = jax.random.normal(k2, (cfg["batch"], cfg["time_o"]),
                                     jnp.float32).astype(dt)
        target = jax.random.normal(k3, (cfg["batch"], cfg["time_o"]),
                                   jnp.float32).astype(dt)
        mask = jax.random.bernoulli(
            k4, 0.8, (cfg["batch"], cfg["time_o"])).astype(dt)

        loss = jax.block_until_ready(
            mase_loss(insample, cfg["freq"], forecast, target, mask,
                      tile_b=cfg["tile_b"]))
        ref = jax.block_until_ready(
            _mase_loss_ref(insample, cfg["freq"], forecast, target, mask))
        assert jnp.allclose(loss, ref, rtol=cfg["rtol"], atol=cfg["atol"]), (
            cfg, loss, ref)

    print("KERNEL_OK")
</pallas_src>

<mosaic_0001>
module attributes {stable_mosaic.version = 11 : i64} {
  func.func @_mase_kernel(%arg0: i32, %arg1: memref<2x32xf32, #tpu.memory_space<vmem>>, %arg2: memref<2x8xf32, #tpu.memory_space<vmem>>, %arg3: memref<2x8xf32, #tpu.memory_space<vmem>>, %arg4: memref<2x8xf32, #tpu.memory_space<vmem>>, %arg5: memref<1x8x128xf32, #tpu.memory_space<vmem>>) attributes {dimension_semantics = [#tpu.dimension_semantics<parallel>], iteration_bounds = array<i64: 1>, scalar_prefetch = 0 : i64, scratch_operands = 0 : i64, tpu.core_type = #tpu.core_type<tc>, window_params = [{transform_indices = @transform_0, window_bounds = array<i64: 2, 32>}, {transform_indices = @transform_1, window_bounds = array<i64: 2, 8>}, {transform_indices = @transform_2, window_bounds = array<i64: 2, 8>}, {transform_indices = @transform_3, window_bounds = array<i64: 2, 8>}, {transform_indices = @transform_4, window_bounds = array<i64: 1, 8, 128>}]} {
    %c0 = arith.constant 0 : index
    %c0_0 = arith.constant 0 : index
    %0 = vector.load %arg1[%c0, %c0_0] : memref<2x32xf32, #tpu.memory_space<vmem>>, vector<2x32xf32>
    %1 = vector.extract_strided_slice %0 {offsets = [0, 4], sizes = [2, 28], strides = [1, 1]} : vector<2x32xf32> to vector<2x28xf32>
    %2 = vector.extract_strided_slice %0 {offsets = [0, 0], sizes = [2, 28], strides = [1, 1]} : vector<2x32xf32> to vector<2x28xf32>
    %3 = arith.subf %1, %2 : vector<2x28xf32>
    %4 = math.absf %3 : vector<2x28xf32>
    %cst = arith.constant dense<0.000000e+00> : vector<2xf32>
    %5 = vector.multi_reduction <add>, %4, %cst [1] : vector<2x28xf32> to vector<2xf32>
    %6 = vector.shape_cast %5 : vector<2xf32> to vector<2x1xf32>
    %cst_1 = arith.constant 0.0357142873 : f32
    %7 = vector.broadcast %cst_1 : f32 to vector<2x1xf32>
    %8 = arith.mulf %6, %7 : vector<2x1xf32>
    %9 = tpu.reciprocal %8 : vector<2x1xf32> -> vector<2x1xf32>
    %10 = arith.cmpf one, %9, %9 : vector<2x1xf32>
    %cst_2 = arith.constant 0x7F800000 : f32
    %11 = vector.broadcast %cst_2 : f32 to vector<2x1xf32>
    %12 = arith.cmpf oeq, %9, %11 : vector<2x1xf32>
    %13 = arith.ori %10, %12 : vector<2x1xi1>
    %cst_3 = arith.constant 0.000000e+00 : f32
    %14 = vector.broadcast %cst_3 : f32 to vector<2x1xf32>
    %15 = arith.select %13, %14, %9 : vector<2x1xi1>, vector<2x1xf32>
    %c0_4 = arith.constant 0 : index
    %c0_5 = arith.constant 0 : index
    %16 = vector.load %arg3[%c0_4, %c0_5] : memref<2x8xf32, #tpu.memory_space<vmem>>, vector<2x8xf32>
    %c0_6 = arith.constant 0 : index
    %c0_7 = arith.constant 0 : index
    %17 = vector.load %arg2[%c0_6, %c0_7] : memref<2x8xf32, #tpu.memory_space<vmem>>, vector<2x8xf32>
    %18 = arith.subf %16, %17 : vector<2x8xf32>
    %19 = math.absf %18 : vector<2x8xf32>
    %c0_8 = arith.constant 0 : index
    %c0_9 = arith.constant 0 : index
    %20 = vector.load %arg4[%c0_8, %c0_9] : memref<2x8xf32, #tpu.memory_space<vmem>>, vector<2x8xf32>
    %21 = vector.broadcast %15 : vector<2x1xf32> to vector<2x8xf32>
    %22 = arith.mulf %20, %21 : vector<2x8xf32>
    %23 = arith.mulf %19, %22 : vector<2x8xf32>
    %24 = vector.shape_cast %23 : vector<2x8xf32> to vector<1x2x8xf32>
    %cst_10 = arith.constant dense<0.000000e+00> : vector<1xf32>
    %25 = vector.multi_reduction <add>, %24, %cst_10 [1, 2] : vector<1x2x8xf32> to vector<1xf32>
    %26 = vector.shape_cast %25 : vector<1xf32> to vector<1x1x1xf32>
    %27 = vector.extract %26[0, 0, 0] : f32 from vector<1x1x1xf32>
    %28 = vector.broadcast %27 : f32 to vector<1x8x128xf32>
    %c0_11 = arith.constant 0 : index
    %c0_12 = arith.constant 0 : index
    %c0_13 = arith.constant 0 : index
    %29 = vector.load %arg5[%c0_11, %c0_12, %c0_13] : memref<1x8x128xf32, #tpu.memory_space<vmem>>, vector<1x8x128xf32>
    tpu.vector_store %arg5[%c0_11, %c0_12, %c0_13], %28 {strides = array<i32>} : memref<1x8x128xf32, #tpu.memory_space<vmem>>, vector<1x8x128xf32>,
    return
  }
  func.func @transform_0(%arg0: i32) -> (i32, i32) {
    %c0_i32 = arith.constant 0 : i32
    %c0_i32_0 = arith.constant 0 : i32
    return %arg0, %c0_i32 : i32, i32
  }
  func.func @transform_1(%arg0: i32) -> (i32, i32) {
    %c0_i32 = arith.constant 0 : i32
    %c0_i32_0 = arith.constant 0 : i32
    return %arg0, %c0_i32 : i32, i32
  }
  func.func @transform_2(%arg0: i32) -> (i32, i32) {
    %c0_i32 = arith.constant 0 : i32
    %c0_i32_0 = arith.constant 0 : i32
    return %arg0, %c0_i32 : i32, i32
  }
  func.func @transform_3(%arg0: i32) -> (i32, i32) {
    %c0_i32 = arith.constant 0 : i32
    %c0_i32_0 = arith.constant 0 : i32
    return %arg0, %c0_i32 : i32, i32
  }
  func.func @transform_4(%arg0: i32) -> (i32, i32, i32) {
    %c0_i32 = arith.constant 0 : i32
    %c0_i32_0 = arith.constant 0 : i32
    %c0_i32_1 = arith.constant 0 : i32
    return %arg0, %c0_i32, %c0_i32_0 : i32, i32, i32
  }
}

</mosaic_0001>

<bundles_post_ra>
// kernel: tpu_custom_call.1
= control target key start
LH: loop header
LB: loop body
LE: loop exit
PB: predicated region body
PF: predicated region fallthrough
CT: control target
= control target key end

     0   :  { %9 = vsyncpa [#allocation3], 0  ;;  %s289_s0 = inlined_call_operand.hbm [shape: f32[2,32], index: 0, kind: input, shape index: {}]   ;;  %s290_s1 = inlined_call_operand.hbm [shape: f32[2,8], index: 1, kind: input, shape index: {}]   ;;  %s291_s2 = inlined_call_operand.hbm [shape: f32[2,8], index: 2, kind: input, shape index: {}]   ;;  %s292_s3 = inlined_call_operand.vmem [shape: f32[2,8], index: 3, kind: input, shape index: {}]   ;;  %s293_s4 = inlined_call_operand.hbm [shape: f32[1,8,128], index: 4, kind: output, shape index: {}]  }
   0x1   :  { %10 = vsyncpa [#allocation6], 0  ;;  %s28_s17 = sshll.u32 %s290_s1, 4  ;;  %s29_s17 = int_to_ptr.hbm [resolvable:$true] %s28_s17 }
   0x2   :  { %11 = vsyncpa [#allocation4], 0  ;;  %s243_s18 = smov [#allocation5]   ;;  %s17_s22 = sshll.u32 %s289_s0, 4  ;;  %s18_s22 = int_to_ptr.hbm [resolvable:$true] %s17_s22 }
   0x3   :  { %s30_s19 = sshll.u32 %s243_s18, 4  ;;  %s244_s23 = smov [#allocation2]   ;;  %s31_s19 = int_to_ptr.vmem [resolvable:$true] %s30_s19 }
   0x4   :  { %33 = dma.hbm_to_vmem [thread:$0]  %s29_s17, 32, %s31_s19, [#allocation6]  }
   0x5   :  { %s19_s24 = sshll.u32 %s244_s23, 4  ;;  %s39_s27 = sshll.u32 %s291_s2, 4  ;;  %s20_s24 = int_to_ptr.vmem [resolvable:$true] %s19_s24  ;;  %s40_s27 = int_to_ptr.hbm [resolvable:$true] %s39_s27 }
   0x6   :  { %22 = dma.hbm_to_vmem [thread:$0]  %s18_s22, 32, %s20_s24, [#allocation3]  }
   0x7   :  { %s245_s1 = smov [#allocation7]  }
   0x8   :  { %s41_s28 = sshll.u32 %s245_s1, 4  ;;  %s42_s28 = int_to_ptr.vmem [resolvable:$true] %s41_s28 }
   0x9   :  { %44 = dma.hbm_to_vmem [thread:$0]  %s40_s27, 32, %s42_s28, [#allocation6]  }
   0xa   :  { %237 = dma.done.wait [#allocation3], 32  }
   0xb   :  { %238 = vsyncadd [#allocation3], 4294967264 }
   0xc   :  { %239 = dma.done.wait [#allocation6], 64  }
   0xd   :  { %240 = vsyncadd [#allocation6], 4294967232  ;;  %v59_v0 = vld [vmem:[#allocation2] sm:$0x3]  ;;  %s246_s0 = smov 4   ;;  %s247_s29 = smov 124  }
   0xe   :  { %61 = vrot.lane.b32.xlu0 %v59_v0, %s246_s0  ;;  %vm70_vm0 = vcmask 222208   ;;  %v93_v14 = vld [vmem:[#allocation7] sm:$0x3]  ;;  %v94_v15 = vld [vmem:[#allocation5] sm:$0x3]  ;;  %vm100_vm8 = vcmask 58368  }
   0xf   :  { %v95_v18 = vsub.f32 %v93_v14, %v94_v15  ;;  %v97_v21 = vld [vmem:[%s292_s3] sm:$0x3]  ;;  %s248_s5 = smov [#allocation8]   ;;  %s120_s8 = sshll.u32 %s293_s4, 4  ;;  %s121_s8 = int_to_ptr.hbm [resolvable:$true] %s120_s8 }
  0x10   :  { %s118_s6 = sshll.u32 %s248_s5, 4  ;;  %s119_s6 = int_to_ptr.vmem [resolvable:$true] %s118_s6 }
  0x11   :  { %v96_v22 = vand.u32 2147483647, %v95_v18 }
  0x80   :  { %v62_v1 = vpop.permute.xlu0 %61 }
  0x81   :  { %v64_v2 = vsub.f32 %v59_v0, %v62_v1 }
  0x83   :  { %v65_v3 = vand.u32 2147483647, %v64_v2 }
  0x85   :  { %67 = vrot.lane.b32.xlu0 %v65_v3, %s247_s29 }
  0xf7   :  { %v68_v4 = vpop.permute.xlu0 %67 }
  0xf8   :  { %v71_v5 = vsel %vm70_vm0, %v68_v4, 0.0 }
  0xf9   :  { %72 = vadd.xlane.f32.xlu1 %v71_v5 }
 0x16c   :  { %v73_v6 = vpop.xlane.xlu1 %72 }
 0x16d   :  { %v74_v7 = vmul.f32 0.035714287, %v73_v6 }
 0x16f   :  { %139 = vrcp.f32 %v74_v7  ;;  %v86_v11 = vand.u32 2147483648, %v74_v7  ;;  %v84_v13 = vand.u32 2147483647, %v74_v7  ;;  %vm80_vm2 = vweird.f32 %v74_v7 }
 0x171   :  { %v87_v17 = vor.u32 1.1754944e-38, %v86_v11  ;;  %vm85_vm4 = vcmp.eq.f32.partialorder %v84_v13, 8.507059e+37 }
 0x175   :  { %v140_v8 = vpop.eup %139 }
 0x176   :  { %v76_v9 = vmul.f32 %v140_v8, %v74_v7  ;;  %vm81_vm1 = vweird.f32 %v140_v8 }
 0x177   :  { %vm82_vm3 = vmor %vm80_vm2, %vm81_vm1 }
 0x178   :  { %v77_v10 = vsub.f32 1.0, %v76_v9 }
 0x17a   :  { %v78_v12 = vmul.f32 %v140_v8, %v77_v10 }
 0x17c   :  { %v79_v16 = vadd.f32 %v140_v8, %v78_v12 }
 0x17e   :  { %v83_v19 = vsel %vm82_vm3, %v140_v8, %v79_v16 }
 0x17f   :  { %v88_v20 = vsel %vm85_vm4, %v87_v17, %v83_v19 }
 0x180   :  { %vm89_vm5 = vcmp.ne.f32.partialorder %v88_v20, %v88_v20  ;;  %vm90_vm6 = vcmp.eq.f32.partialorder %v88_v20, inf }
 0x181   :  { %vm91_vm7 = vmor %vm89_vm5, %vm90_vm6 }
 0x182   :  { %v92_v23 = vsel %vm91_vm7, 0.0, %v88_v20 }
 0x183   :  { %v98_v24 = vmul.f32 %v97_v21, %v92_v23 }
 0x185   :  { %v99_v25 = vmul.f32 %v98_v24, %v96_v22 }
 0x187   :  { %v101_v26 = vsel %vm100_vm8, %v99_v25, 0.0 }
 0x188   :  { %102 = vadd.xlane.f32.xlu1 %v101_v26 }
 0x1fb   :  { %v103_v27 = vpop.xlane.xlu1 %102 }
 0x1fc   :  { %v104_v28 = vrot.slane %v103_v27, 4 }
 0x1fe   :  { %v105_v29 = vadd.f32 %v104_v28, %v103_v27 }
 0x200   :  { %v106_v30 = vrot.slane %v105_v29, 2 }
 0x202   :  { %v107_v31 = vadd.f32 %v106_v30, %v105_v29 }
 0x204   :  { %v108_v32 = vrot.slane %v107_v31, 1 }
 0x206   :  { %v109_v33 = vadd.f32 %v108_v32, %v107_v31 }
 0x208   :  { %131 = vpush %v109_v33 }
 0x239   :  { %s132_s9 = spop %131 }
 0x23a   :  { %v111_v34 = vstv %s132_s9 }
 0x23b   :  { %112 = vst [vmem:[#allocation8] sm:$0xff] %v111_v34 }
 0x23c   :  { %123 = dma.vmem_to_hbm [thread:$0]  %s119_s6, 128, %s121_s8, [#allocation4]  }
 0x23d   :  { %241 = dma.done.wait [#allocation4], 128  }
 0x23e   :  { %242 = vsyncadd [#allocation4], 4294967168 }
 0x23f   :  { %128 = vsyncpa [#allocation3], 1 }
 0x240   :  { %129 = vsyncpa [#allocation6], 1 }
 0x241   :  { %130 = vsyncpa [#allocation4], 1 }

</bundles_post_ra>
